<compile_context>
chip_gen: v5e
topology: v5e:2x2
jax: 0.10.0
libtpu: 0.0.40
codegen_flags: <defaults>
</compile_context>

<pallas_src>
import jax
import jax.numpy as jnp
from jax.experimental import pallas as pl
from jax.experimental.pallas import tpu as pltpu


# ----------------------------------------------------------------------------
# helpers
# ----------------------------------------------------------------------------
def _round_up(x: int, m: int) -> int:
    return ((x + m - 1) // m) * m


def _choose_mode_tile(modes: int, per_mode_bytes: int,
                      budget_bytes: int = 8 * 1024 * 1024) -> int:
    """How many Fourier modes per grid step.

    Sizes the per-step working set (x + w + out tiles) to ~8 MiB so the 2x
    double-buffered footprint stays well under the 32 MiB VMEM limit (v7x has
    64 MiB/TC total), while keeping >= 4 grid steps when `modes` allows so the
    prologue DMA is hidden and both v7x TensorCores get >= 2 steps.
    """
    mt = max(1, budget_bytes // max(per_mode_bytes, 1))
    mt = min(mt, modes)
    min_steps = 4 if modes >= 4 else (2 if modes >= 2 else 1)
    mt = min(mt, max(1, modes // min_steps))
    return int(mt)


# ----------------------------------------------------------------------------
# Pallas kernels: batched (over modes) MXU matmuls, bf16 operands, f32 acc
# ----------------------------------------------------------------------------
def _block_mix_kernel(x_ref, w_ref, o_ref):
    # x: (mt, Bp, 2Cin_p) bf16 ; w: (mt, 2Cin_p, 2Cout_p) bf16 ; o: f32
    o_ref[...] = jnp.einsum('mbk,mkn->mbn', x_ref[...], w_ref[...],
                            preferred_element_type=jnp.float32)


def _split_mix_kernel(xr_ref, xi_ref, wr_ref, wi_ref, or_ref, oi_ref):
    # Complex multiply as four real batched matmuls (halves the weight stream
    # vs the 2x2 block matrix when channels are already 128-aligned).
    def mm(a, b):
        return jnp.einsum('mbk,mkn->mbn', a, b,
                          preferred_element_type=jnp.float32)
    xr, xi = xr_ref[...], xi_ref[...]
    wr, wi = wr_ref[...], wi_ref[...]
    or_ref[...] = mm(xr, wr) - mm(xi, wi)
    oi_ref[...] = mm(xr, wi) + mm(xi, wr)


_VMEM_LIMIT = 32 * 1024 * 1024      # v7x-safe (64 MiB/TC physical)


def _mode_mix_block(xcat, wcat, mt):
    """xcat: (Mpad, Bp, Kp) bf16; wcat: (Mpad, Kp, Np) bf16 -> (Mpad, Bp, Np) f32."""
    mpad, bp, kp = xcat.shape
    np_ = wcat.shape[2]
    cost = pl.CostEstimate(
        flops=int(2 * mpad * bp * kp * np_),
        transcendentals=0,
        bytes_accessed=int(2 * xcat.size + 2 * wcat.size + 4 * mpad * bp * np_),
    )
    grid_spec = pltpu.PrefetchScalarGridSpec(
        num_scalar_prefetch=0,
        grid=(mpad // mt,),
        in_specs=[pl.BlockSpec((mt, bp, kp), lambda m: (m, 0, 0)),
                  pl.BlockSpec((mt, kp, np_), lambda m: (m, 0, 0))],
        out_specs=pl.BlockSpec((mt, bp, np_), lambda m: (m, 0, 0)),
    )
    return pl.pallas_call(
        _block_mix_kernel,
        out_shape=jax.ShapeDtypeStruct((mpad, bp, np_), jnp.float32),
        grid_spec=grid_spec,
        compiler_params=pltpu.CompilerParams(
            dimension_semantics=("parallel",),
            vmem_limit_bytes=_VMEM_LIMIT,
        ),
        cost_estimate=cost,
    )(xcat, wcat)


def _mode_mix_split(xr, xi, wr, wi, mt):
    """Split re/im path for wide channels. All inputs (Mpad, ., .) bf16."""
    mpad, bp, cin_p = xr.shape
    cout_p = wr.shape[2]
    cost = pl.CostEstimate(
        flops=int(4 * 2 * mpad * bp * cin_p * cout_p),
        transcendentals=0,
        bytes_accessed=int(2 * (xr.size + xi.size + wr.size + wi.size)
                           + 4 * 2 * mpad * bp * cout_p),
    )
    x_spec = pl.BlockSpec((mt, bp, cin_p), lambda m: (m, 0, 0))
    w_spec = pl.BlockSpec((mt, cin_p, cout_p), lambda m: (m, 0, 0))
    o_spec = pl.BlockSpec((mt, bp, cout_p), lambda m: (m, 0, 0))
    grid_spec = pltpu.PrefetchScalarGridSpec(
        num_scalar_prefetch=0,
        grid=(mpad // mt,),
        in_specs=[x_spec, x_spec, w_spec, w_spec],
        out_specs=[o_spec, o_spec],
    )
    return pl.pallas_call(
        _split_mix_kernel,
        out_shape=(jax.ShapeDtypeStruct((mpad, bp, cout_p), jnp.float32),
                   jax.ShapeDtypeStruct((mpad, bp, cout_p), jnp.float32)),
        grid_spec=grid_spec,
        compiler_params=pltpu.CompilerParams(
            dimension_semantics=("parallel",),
            vmem_limit_bytes=_VMEM_LIMIT,
        ),
        cost_estimate=cost,
    )(xr, xi, wr, wi)


# ----------------------------------------------------------------------------
# One-time weight packing (parameter-init time, NOT per forward)
# ----------------------------------------------------------------------------
def pack_spectral_weights(weights_re, weights_im, *, max_batch=16):
    """Re-layout, pad and bf16-cast the SpectralConv1d weights once.

    Returns a dict consumed by `spectral_conv1d`. `max_batch` only informs
    the VMEM-budget mode-tile choice, not correctness.
    """
    Cin, Cout, modes = weights_re.shape
    bp = _round_up(max(int(max_batch), 1), 16)       # bf16-packed batch estimate
    wr = jnp.transpose(weights_re, (2, 0, 1)).astype(jnp.float32)   # (modes, Cin, Cout)
    wi = jnp.transpose(weights_im, (2, 0, 1)).astype(jnp.float32)

    if Cin >= 128 and Cout >= 128:
        # Wide channels: ship wr / wi separately (half the weight bytes of the
        # block matrix); K/N land on 128/256 multiples naturally.
        cin_p = _round_up(Cin, 128)
        cout_p = _round_up(Cout, 128)
        per_mode = 4 * bp * cin_p + 4 * cin_p * cout_p + 8 * bp * cout_p
        mt = _choose_mode_tile(modes, per_mode)
        mpad = _round_up(modes, mt)
        pads = ((0, mpad - modes), (0, cin_p - Cin), (0, cout_p - Cout))
        return dict(layout="split", modes=modes, cin=Cin, cout=Cout,
                    cin_p=cin_p, cout_p=cout_p, mt=mt, mpad=mpad,
                    wr=jnp.pad(wr, pads).astype(jnp.bfloat16),
                    wi=jnp.pad(wi, pads).astype(jnp.bfloat16))

    # Small channels: 2x2 real block matrix [[wr, wi], [-wi, wr]] so the single
    # matmul's K/N fill a 128-lane tile instead of padding Cin/Cout separately.
    kp = _round_up(2 * Cin, 128)
    np_ = _round_up(2 * Cout, 128)
    wcat = jnp.concatenate(
        [jnp.concatenate([wr, wi], axis=2),
         jnp.concatenate([-wi, wr], axis=2)], axis=1)          # (modes, 2Cin, 2Cout)
    per_mode = 2 * bp * kp + 2 * kp * np_ + 4 * bp * np_
    mt = _choose_mode_tile(modes, per_mode)
    mpad = _round_up(modes, mt)
    pads = ((0, mpad - modes), (0, kp - 2 * Cin), (0, np_ - 2 * Cout))
    return dict(layout="block", modes=modes, cin=Cin, cout=Cout,
                kp=kp, np=np_, mt=mt, mpad=mpad,
                wcat=jnp.pad(wcat, pads).astype(jnp.bfloat16))


# ----------------------------------------------------------------------------
# SpectralConv1d forward
# ----------------------------------------------------------------------------
def spectral_conv1d(x, packed):
    """x: [B, Cin, N] f32; packed: output of pack_spectral_weights.
    Returns [B, Cout, N] f32 (matches the PyTorch SpectralConv1d forward)."""
    B, Cin, N = x.shape
    assert Cin == packed["cin"]
    modes, Cout = packed["modes"], packed["cout"]
    mt, mpad = packed["mt"], packed["mpad"]
    n_freq = N // 2 + 1

    # FFT (XLA glue)
    x_low = jnp.fft.rfft(x, axis=-1)[:, :, :modes]            # [B, Cin, modes] c64
    xr = jnp.real(x_low).astype(jnp.float32)
    xi = jnp.imag(x_low).astype(jnp.float32)

    bp = _round_up(B, 16)    # full (16,128) bf16 vregs -> unmasked stores

    if packed["layout"] == "block":
        kp, np_ = packed["kp"], packed["np"]
        xcat = jnp.transpose(jnp.concatenate([xr, xi], axis=1), (2, 0, 1))  # (modes, B, 2Cin)
        xcat = jnp.pad(xcat, ((0, mpad - modes), (0, bp - B),
                              (0, kp - 2 * Cin))).astype(jnp.bfloat16)
        out = _mode_mix_block(xcat, packed["wcat"], mt)        # (mpad, bp, np_) f32
        out_re = out[:modes, :B, :Cout]
        out_im = out[:modes, :B, Cout:2 * Cout]
    else:
        cin_p = packed["cin_p"]
        pads = ((0, mpad - modes), (0, bp - B), (0, cin_p - Cin))
        xr_m = jnp.pad(jnp.transpose(xr, (2, 0, 1)), pads).astype(jnp.bfloat16)
        xi_m = jnp.pad(jnp.transpose(xi, (2, 0, 1)), pads).astype(jnp.bfloat16)
        ore, oim = _mode_mix_split(xr_m, xi_m, packed["wr"], packed["wi"], mt)
        out_re = ore[:modes, :B, :Cout]
        out_im = oim[:modes, :B, :Cout]

    out_low = jnp.transpose(out_re + 1j * out_im, (1, 2, 0)).astype(jnp.complex64)
    out_ft = jnp.pad(out_low, ((0, 0), (0, 0), (0, n_freq - modes)))

    # Inverse FFT (XLA glue)
    y = jnp.fft.irfft(out_ft, n=N, axis=-1)                    # [B, Cout, N]
    return y.astype(jnp.float32)


# ----------------------------------------------------------------------------
# Pure-JAX reference (mirrors the PyTorch forward)
# ----------------------------------------------------------------------------
def spectral_conv1d_ref(x, weights_re, weights_im, modes):
    B, Cin, N = x.shape
    Cout = weights_re.shape[1]
    n_freq = N // 2 + 1
    w = (weights_re + 1j * weights_im).astype(jnp.complex64)
    x_ft = jnp.fft.rfft(x, axis=-1)
    out_low = jnp.einsum('bix,iox->box', x_ft[:, :, :modes], w)
    out_ft = jnp.zeros((B, Cout, n_freq), dtype=jnp.complex64)
    out_ft = out_ft.at[:, :, :modes].set(out_low)
    return jnp.fft.irfft(out_ft, n=N, axis=-1)


if __name__ == "__main__":
    key = jax.random.PRNGKey(0)

    def init_weights(k, cin, cout, modes):
        # Mirrors scale * torch.rand(in, out, modes, dtype=cfloat).
        scale = 1.0 / (cin * cout)
        kr, ki = jax.random.split(k)
        wre = scale * jax.random.uniform(kr, (cin, cout, modes), dtype=jnp.float32)
        wim = scale * jax.random.uniform(ki, (cin, cout, modes), dtype=jnp.float32)
        return wre, wim

    k1, k2, k3, k4 = jax.random.split(key, 4)

    # --- small config: exercises the block-matrix path ---
    B, Cin, Cout, modes, N = 2, 4, 4, 5, 16
    wre, wim = init_weights(k1, Cin, Cout, modes)
    x = jax.random.normal(k2, (B, Cin, N), dtype=jnp.float32)
    packed = pack_spectral_weights(wre, wim, max_batch=B)
    y = jax.block_until_ready(spectral_conv1d(x, packed))
    y_ref = spectral_conv1d_ref(x, wre, wim, modes)
    assert y.shape == (B, Cout, N)
    # bf16 operands -> tolerance loosened accordingly (review note).
    assert jnp.allclose(y, y_ref, atol=5e-2, rtol=5e-2), "block-path mismatch"

    # --- wide-channel config: exercises the split re/im path ---
    B2, C2, modes2, N2 = 2, 128, 5, 16
    wre2, wim2 = init_weights(k3, C2, C2, modes2)
    x2 = jax.random.normal(k4, (B2, C2, N2), dtype=jnp.float32)
    packed2 = pack_spectral_weights(wre2, wim2, max_batch=B2)
    y2 = jax.block_until_ready(spectral_conv1d(x2, packed2))
    y2_ref = spectral_conv1d_ref(x2, wre2, wim2, modes2)
    assert y2.shape == (B2, C2, N2)
    assert jnp.allclose(y2, y2_ref, atol=1e-3, rtol=5e-2), "split-path mismatch"

    print("KERNEL_OK")
</pallas_src>

<mosaic_0001>
module attributes {stable_mosaic.version = 11 : i64} {
  func.func @_block_mix_kernel(%arg0: i32, %arg1: memref<1x16x128xbf16, #tpu.memory_space<vmem>>, %arg2: memref<1x128x128xbf16, #tpu.memory_space<vmem>>, %arg3: memref<1x16x128xf32, #tpu.memory_space<vmem>>) attributes {dimension_semantics = [#tpu.dimension_semantics<parallel>], iteration_bounds = array<i64: 5>, scalar_prefetch = 0 : i64, scratch_operands = 0 : i64, tpu.core_type = #tpu.core_type<tc>, window_params = [{transform_indices = @transform_0, window_bounds = array<i64: 1, 16, 128>}, {transform_indices = @transform_1, window_bounds = array<i64: 1, 128, 128>}, {transform_indices = @transform_2, window_bounds = array<i64: 1, 16, 128>}]} {
    %c0 = arith.constant 0 : index
    %c0_0 = arith.constant 0 : index
    %c0_1 = arith.constant 0 : index
    %0 = vector.load %arg1[%c0, %c0_0, %c0_1] : memref<1x16x128xbf16, #tpu.memory_space<vmem>>, vector<1x16x128xbf16>
    %c0_2 = arith.constant 0 : index
    %c0_3 = arith.constant 0 : index
    %c0_4 = arith.constant 0 : index
    %1 = vector.load %arg2[%c0_2, %c0_3, %c0_4] : memref<1x128x128xbf16, #tpu.memory_space<vmem>>, vector<1x128x128xbf16>
    "tpu.trace_start"() <{level = 10 : i32, message = "mbk,mkn->mbn"}> : () -> ()
    %cst = arith.constant dense<0.000000e+00> : vector<1x16x128xf32>
    %2 = tpu.matmul %0, %1, %cst {dimension_numbers = #tpu.dot_dimension_numbers<[2], [1], [1], [2], [0, 0, 0, 1, 1, 2], [0], [0]>} : vector<1x16x128xbf16>, vector<1x128x128xbf16>, vector<1x16x128xf32> -> vector<1x16x128xf32>
    "tpu.trace_stop"() : () -> ()
    %c0_5 = arith.constant 0 : index
    %c0_6 = arith.constant 0 : index
    %c0_7 = arith.constant 0 : index
    %3 = vector.load %arg3[%c0_5, %c0_6, %c0_7] : memref<1x16x128xf32, #tpu.memory_space<vmem>>, vector<1x16x128xf32>
    tpu.vector_store %arg3[%c0_5, %c0_6, %c0_7], %2 {strides = array<i32>} : memref<1x16x128xf32, #tpu.memory_space<vmem>>, vector<1x16x128xf32>,
    return
  }
  func.func @transform_0(%arg0: i32) -> (i32, i32, i32) {
    %c0_i32 = arith.constant 0 : i32
    %c0_i32_0 = arith.constant 0 : i32
    %c0_i32_1 = arith.constant 0 : i32
    return %arg0, %c0_i32, %c0_i32_0 : i32, i32, i32
  }
  func.func @transform_1(%arg0: i32) -> (i32, i32, i32) {
    %c0_i32 = arith.constant 0 : i32
    %c0_i32_0 = arith.constant 0 : i32
    %c0_i32_1 = arith.constant 0 : i32
    return %arg0, %c0_i32, %c0_i32_0 : i32, i32, i32
  }
  func.func @transform_2(%arg0: i32) -> (i32, i32, i32) {
    %c0_i32 = arith.constant 0 : i32
    %c0_i32_0 = arith.constant 0 : i32
    %c0_i32_1 = arith.constant 0 : i32
    return %arg0, %c0_i32, %c0_i32_0 : i32, i32, i32
  }
}

</mosaic_0001>

<bundles_post_ra>
// kernel: tpu_custom_call.1
= control target key start
LH: loop header
LB: loop body
LE: loop exit
PB: predicated region body
PF: predicated region fallthrough
CT: control target
= control target key end

     0   :  { %s840_s0 = inlined_call_operand.hbm [shape: bf16[5,16,128], index: 0, kind: input, shape index: {}]   ;;  %s841_s1 = inlined_call_operand.hbm [shape: bf16[5,128,128], index: 1, kind: input, shape index: {}]   ;;  %s842_s2 = inlined_call_operand.hbm [shape: f32[5,16,128], index: 2, kind: output, shape index: {}]  }
   0x1   :  { %843 = sst [smem:[#allocation11_spill]] %s840_s0 }
   0x2   :  { %7 = vsyncpa [#allocation3], 0 }
   0x3   :  { %9 = vsyncpa [#allocation3 + $0x1], 0 }
   0x4   :  { %10 = vsyncpa [#allocation6], 0 }
   0x5   :  { %12 = vsyncpa [#allocation6 + $0x1], 0 }
   0x6   :  { %13 = vsyncpa [#allocation4], 0 }
   0x7   :  { %15 = vsyncpa [#allocation4 + $0x1], 0  ;;  %s678_s9 = smov 0   ;;  %s680_s10 = smov 0  }
   0x8   :  { %s682_s11 = smov 0   ;;  %s684_s12 = smov 0  }
   0x9 LB: > { %s699_s13 = sadd.s32 4294967295, %s657_s12   ;;  %s406_s14 = sadd.s32 4294967294, %s657_s12   ;;  %s657_s12 = sphi %s684_s12, %s854_s12   ;;  %s653_s11 = sphi %s682_s11, %s853_s11   ;;  %s649_s10 = sphi %s680_s10, %s852_s10   ;;  %s645_s9 = sphi %s678_s9, %s851_s9  }
   0xa   : > { %s703_s15 = sadd.s32 1, %s657_s12   ;;  %s28_s16 = sadd.s32 1, %s653_s11 }
   0xb   : > { %s25_s17 = ssub.s32 %s657_s12, %s703_s15  ;;  %p35_p0 = scmp.ne.s32.totalorder %s653_s11, %s649_s10 }
   0xc   : > { %p26_p1 = scmp.eq.s32.totalorder %s25_s17, 0  ;;  %p36_p2 = scmp.eq.s32.totalorder %s657_s12, 0 }
   0xd   : > { %p41_p3 = scmp.ne.s32.totalorder %s649_s10, %s645_s9  ;;  %p42_p4 = scmp.eq.s32.totalorder %s699_s13, 0 }
   0xe   : > { %s715_s18 = scalar_select %p26_p1, %s653_s11, %s28_s16  }
   0xf   : > { %p717_p5 = por %p36_p2, %p35_p0  ;;  %p721_p6 = por %p42_p4, %p41_p3 }
  0x10   : > { %p91_p7 = scmp.eq.s32.totalorder %s699_s13, 4  ;;  %p97_p8 = scmp.eq.s32.totalorder %s406_s14, 4 }
  0x11   : > { %p489_p9 = scmp.lt.s32.totalorder %s657_s12, 5  ;;  %s736_s23 = sand.u32 1, %s653_s11  }
  0x12   : > { %p727_p10 = por %p91_p7, %p35_p0  ;;  %p731_p11 = por %p97_p8, %p41_p3 }
  0x13   : > { %s460_s24 = sshll.u32 %s657_s12, 3  ;;  %s409_s25 = sshll.u32 %s736_s23, 3 }
  0x14   : > { %s848_s0 = sld [smem:[#allocation11_spill]]  ;;  %s121_s30 = scalar_lea.vmem [#allocation2], %s409_s25 }
  0x15   : > { %s129_s3 = sshll.u32 %s121_s30, 4  ;;  %p745_p12 = pnand %p489_p9, %p717_p5  ;;  %s130_s3 = int_to_ptr.vmem [resolvable:$true] %s129_s3 }
  0x16   : > { %p415_p13 = scmp.ge.s32.totalorder %s657_s12, 1  ;;  %p159_p0 = scmp.lt.s32.totalorder %s657_s12, 6 }
  0x17   : > { %s118_s5 = scalar_lea.sflag [#allocation3], %s736_s23  ;;  %p531_p2 = pneg %p745_p12 }
  0x1a   : > { %s126_s28 = scalar_lea.hbm %s848_s0, %s460_s24  ;;  %s534_s16 = scalar_lea.hbm %s848_s0, 40 }
  0x1b   : > { %s127_s29 = sshll.u32 %s126_s28, 4  ;;  %s128_s29 = int_to_ptr.hbm [resolvable:$true] %s127_s29 }
  0x1c   : > { %s527_s6 = sshra.s32 %s128_s29, 4  ;;  %s528_s6 = int_to_ptr.hbm [resolvable:$true] %s527_s6 }
  0x1d   : > { %s529_s7 = scalar_lea.hbm %s528_s6, 8  ;;  %p535_p5 = scmp.lt.s32.totalorder %s528_s6, %s848_s0 }
  0x1e   : > { %p530_p1 = scmp.ne.s32.totalorder %s528_s6, %s529_s7  ;;  %p536_p7 = scmp.lt.s32.totalorder %s534_s16, %s529_s7 }
  0x20   : > { %p532_p3 = pnand %p531_p2, %p530_p1  ;;  %p537_p8 = por %p536_p7, %p535_p5 }
  0x22   : > { %p533_p4 = pneg %p532_p3 }
  0x24   : > { %p538_p9 = pnand %p537_p8, %p533_p4 }
  0x26   : > { %541 = shalt.err (!%p538_p9)
}
  0x27   : > { %s659_s24 = smov 64   ;;  %s660_s25 = smov 4  }
  0x28   : > { %481 = dma.hbm_to_vmem [thread:$0]  (!%p745_p12), %s128_s29, 128, %s130_s3, %s118_s5, %s659_s24, %s659_s24, %s660_s25  }
  0x29   : > { %p769_p1 = pnand %p415_p13, %p159_p0  ;;  %s412_s27 = sshll.u32 %s736_s23, 6 }
  0x2a   : > { %s461_s28 = sshll.u32 %s657_s12, 6  ;;  %s143_s14 = scalar_lea.vmem [#allocation5], %s412_s27 }
  0x2b   : > { %s148_s7 = scalar_lea.hbm %s841_s1, %s461_s28  ;;  %s151_s16 = sshll.u32 %s143_s14, 4  ;;  %s152_s16 = int_to_ptr.vmem [resolvable:$true] %s151_s16 }
  0x2c   : > { %s149_s8 = sshll.u32 %s148_s7, 4  ;;  %s140_s17 = scalar_lea.sflag [#allocation6], %s736_s23  ;;  %s150_s8 = int_to_ptr.hbm [resolvable:$true] %s149_s8 }
  0x2d   : > { %s557_s19 = sshra.s32 %s150_s8, 4  ;;  %s564_s0 = scalar_lea.hbm %s841_s1, 320  ;;  %s558_s19 = int_to_ptr.hbm [resolvable:$true] %s557_s19 }
  0x2e   : > { %s559_s29 = scalar_lea.hbm %s558_s19, 64  ;;  %p565_p4 = scmp.lt.s32.totalorder %s558_s19, %s841_s1 }
  0x2f   : > { %p560_p3 = scmp.ne.s32.totalorder %s558_s19, %s559_s29  ;;  %p566_p5 = scmp.lt.s32.totalorder %s564_s0, %s559_s29 }
  0x31   : > { %p562_p13 = pnand %p560_p3, %p531_p2  ;;  %p567_p7 = por %p566_p5, %p565_p4 }
  0x33   : > { %p563_p0 = pneg %p562_p13 }
  0x35   : > { %p568_p8 = pnand %p567_p7, %p563_p0 }
  0x37   : > { %571 = shalt.err (!%p568_p8)
}
  0x38   : > { %484 = dma.hbm_to_vmem [thread:$0]  (!%p745_p12), %s150_s8, 1024, %s152_s16, %s140_s17, %s659_s24, %s659_s24, %s660_s25  }
  0x39   : > { %163 = sbr.rel (%p769_p1) target bundleno = 236 (0xec), region = 28  ;;  %s793_s23 = sand.u32 (!%p769_p1), 1, %s649_s10  }
  0x3a   : > { %s416_s27 = sshll.u32 (!%p769_p1), %s793_s23, 3  ;;  %s166_s6 = scalar_lea.sflag (!%p769_p1), [#allocation3], %s793_s23 }
  0x3b   : > { %s169_s7 = scalar_lea.vmem (!%p769_p1), [#allocation2], %s416_s27 }
  0x3e   : > { %632 = dma.done.wait (%p721_p6), %s166_s6, 128  }
  0x3f   : > { %634 = vsyncadd (%p721_p6), %s166_s6, 4294967168  ;;  %s417_s0 = sshll.u32 %s793_s23, 6  ;;  %s176_s4 = scalar_lea.sflag [#allocation6], %s793_s23 }
  0x40   : > { %s179_s24 = scalar_lea.vmem [#allocation5], %s417_s0 }
  0x41   : > { %636 = dma.done.wait (%p721_p6), %s176_s4, 1024  }
  0x42   : > { %638 = vsyncadd (%p721_p6), %s176_s4, 4294966272  ;;  %v470_v0 = vld [vmem:[%s179_s24 + $0x38] sm:$0xff]  ;;  %v469_v1 = vld [vmem:[%s179_s24 + $0x30] sm:$0xff]  ;;  %s418_s20 = sshll.u32 %s793_s23, 4  ;;  %s471_s25 = sshll.u32 %s699_s13, 4 }
  0x43   : > { %278 = vmatpush.bf16.msra.mxu0 %v470_v0  ;;  %v468_v2 = vld [vmem:[%s179_s24 + $0x28] sm:$0xff]  ;;  %v467_v3 = vld [vmem:[%s179_s24 + $0x20] sm:$0xff]  ;;  %v466_v4 = vld [vmem:[%s179_s24 + $0x18] sm:$0xff]  ;;  %s306_s14 = scalar_lea.hbm %s842_s2, %s471_s25  ;;  %s205_s16 = scalar_lea.vmem [#allocation7], %s418_s20 }
  0x44   : > { %v465_v5 = vld [vmem:[%s179_s24 + $0x10] sm:$0xff]  ;;  %v464_v6 = vld [vmem:[%s179_s24 + $0x8] sm:$0xff]  ;;  %v463_v7 = vld [vmem:[%s179_s24] sm:$0xff]  ;;  %s307_s17 = sshll.u32 %s205_s16, 4  ;;  %s309_s19 = sshll.u32 %s306_s14, 4  ;;  %s308_s17 = int_to_ptr.vmem [resolvable:$true] %s307_s17  ;;  %s310_s19 = int_to_ptr.hbm [resolvable:$true] %s309_s19 }
  0x45   : > { %v462_v8 = vld [vmem:[%s169_s7] sm:$0xff]  ;;  %s295_s29 = scalar_lea.sflag [#allocation4], %s793_s23  ;;  %s601_s3 = sshra.s32 %s310_s19, 4  ;;  %s602_s3 = int_to_ptr.hbm [resolvable:$true] %s601_s3 }
  0x46   : > { %s603_s5 = scalar_lea.hbm %s602_s3, 16  ;;  %s607_s28 = scalar_lea.hbm %s842_s2, 80 }
  0x47   : > { %279 = vmatpush.bf16.msra.mxu0 %v469_v1  ;;  %p604_p6 = scmp.ne.s32.totalorder %s602_s3, %s603_s5  ;;  %p608_p9 = scmp.lt.s32.totalorder %s602_s3, %s842_s2 }
  0x48   : > { %p609_p1 = scmp.lt.s32.totalorder %s607_s28, %s603_s5 }
  0x49   : > { %p605_p12 = pnand %p604_p6, %p727_p10 }
  0x4a   : > { %p610_p3 = por %p609_p1, %p608_p9 }
  0x4b   : > { %280 = vmatpush.bf16.msra.mxu0 %v468_v2  ;;  %p606_p2 = pneg %p605_p12 }
  0x4d   : > { %p611_p13 = pnand %p610_p3, %p606_p2 }
  0x4f   : > { %281 = vmatpush.bf16.msra.mxu0 %v467_v3 }
  0x53   : > { %282 = vmatpush.bf16.msra.mxu0 %v466_v4 }
  0x57   : > { %283 = vmatpush.bf16.msra.mxu0 %v465_v5 }
  0x5b   : > { %284 = vmatpush.bf16.msra.mxu0 %v464_v6 }
  0x5f   : > { %285 = vmatpush.bf16.msra.mxu0 %v463_v7 }
  0x62   : > { %286 = vmatmul.bf16.vlgmr.msra.gmra.mxu0 %v462_v8 }
  0xdf   : > { %v287_v9 = vpop.f32.mrf.mxu0 }
  0xe0   : > { %292 = vst [vmem:[%s205_s16] sm:$0xff] %v287_v9 }
  0xe7   : > { %v289_v10 = vpop.f32.mrf.mxu0 }
  0xe8   : > { %293 = vst [vmem:[%s205_s16 + $0x8] sm:$0xff] %v289_v10 }
  0xe9   : > { %614 = shalt.err (!%p611_p13)
}
  0xea   : > { %s661_s23 = smov 128   ;;  %s662_s7 = smov 8  }
  0xeb   : > { %476 = dma.vmem_to_hbm [thread:$0]  (%p727_p10), %s308_s17, 256, %s310_s19, %s295_s29, %s661_s23, %s661_s23, %s662_s7  }
  0xec PF: > { %p490_p0 = scmp.ge.s32.totalorder %s657_s12, 2  ;;  %s324_s0 = sand.u32 1, %s645_s9  }
  0xed   : > { %s325_s4 = scalar_lea.sflag [#allocation4], %s324_s0 }
  0xee   : > { %p486_p4 = pnand %p490_p0, %p731_p11 }
  0xf0   : > { %p487_p5 = pneg %p486_p4 }
  0xf2   : > { %640 = dma.done.wait (%p487_p5), %s325_s4, 256  }
  0xf3   : > { %642 = vsyncadd (%p487_p5), %s325_s4, 4294967040  ;;  %p18_p7 = scmp.ge.s32.totalorder %s703_s15, 7   ;;  %s851_s9 = smov %s649_s10 }
  0xf4   : > { %s852_s10 = smov %s653_s11  ;;  %s853_s11 = smov %s715_s18 }
  0xf5   : > { %s854_s12 = smov %s703_s15  ;;  %20 = sbr.rel (!%p18_p7) target bundleno = 9 (0x9), region = 86 }
  0xfa   :  { %331 = vsyncpa [#allocation3], 1 }
  0xfb   :  { %333 = vsyncpa [#allocation3 + $0x1], 1 }
  0xfc   :  { %334 = vsyncpa [#allocation6], 1 }
  0xfd   :  { %336 = vsyncpa [#allocation6 + $0x1], 1 }
  0xfe   :  { %337 = vsyncpa [#allocation4], 1 }
  0xff   :  { %339 = vsyncpa [#allocation4 + $0x1], 1 }

</bundles_post_ra>
